<compile_context>
chip_gen: v6e
topology: v6e:2x2x1
jax: 0.10.0
libtpu: 0.0.40
codegen_flags: <defaults>
</compile_context>

<pallas_src>
import functools

import jax
import jax.numpy as jnp
from jax.experimental import pallas as pl
from jax.experimental.pallas import tpu as pltpu


def _se_kernel(x_ref, w1t_ref, w2t_ref, o_ref, *, channels_last):
    # x_ref / o_ref: (TB, C, L) if not channels_last else (TB, L, C)
    # w1t_ref: (C, H)    w2t_ref: (H, C)
    length_axis = 1 if channels_last else 2

    # Squeeze: AdaptiveAvgPool1d(1) == mean over the length axis.
    # Reduce directly from the VMEM ref (don't keep the tile live in vregs).
    y = jnp.mean(x_ref[...].astype(jnp.float32), axis=length_axis)      # (TB, C)

    # Excitation MLP: ReLU(y @ W1^T) -> (y @ W2^T). Tiny; left on the MXU.
    h = jnp.dot(y, w1t_ref[...], preferred_element_type=jnp.float32)    # (TB, H)
    h = jnp.maximum(h, 0.0)
    s = jnp.dot(h, w2t_ref[...], preferred_element_type=jnp.float32)    # (TB, C)

    # Sigmoid via EUP exp + approximate EUP reciprocal, refined with one
    # Newton-Raphson step so accuracy stays ~f32 while the VALU divide slot
    # (binding unit of the scale pass) stays free.
    denom = 1.0 + jnp.exp(-s)
    r = pl.reciprocal(denom, approx=True)
    gate = r * (2.0 - denom * r)                                        # (TB, C)

    # Scale pass: re-read x from VMEM and broadcast the per-channel gate.
    if channels_last:
        scaled = x_ref[...].astype(jnp.float32) * gate[:, None, :]
    else:
        scaled = x_ref[...].astype(jnp.float32) * gate[:, :, None]
    o_ref[...] = scaled.astype(o_ref.dtype)


def _largest_divisor_at_most(n, cap):
    cap = max(1, min(n, cap))
    for d in range(cap, 0, -1):
        if n % d == 0:
            return d
    return 1


def se_layer(x, w1, w2, *, block_b=None, vmem_budget_bytes=16 * 1024 * 1024):
    """Squeeze-and-excitation forward.

    x : (B, C, L) activations (NCL, PyTorch layout)
    w1: (C//r, C)  first Linear weight (PyTorch (out, in) layout, bias-free)
    w2: (C, C//r)  second Linear weight
    """
    B, C, L = x.shape
    H = w1.shape[0]
    w1t = jnp.transpose(w1)          # (C, H)
    w2t = jnp.transpose(w2)          # (H, C)

    # Layout: NCL is already lane-dense when L is large; use channels-last
    # when L is small and C fills the 128-lane axis cleanly.
    channels_last = (L < 128) and (C % 128 == 0)
    if channels_last:
        x_in = jnp.transpose(x, (0, 2, 1))     # (B, L, C): C on the lane axis
        blk_tail = (L, C)
    else:
        x_in = x
        blk_tail = (C, L)

    itemsize = x.dtype.itemsize
    # Per-grid-step VMEM footprint ~= 2 buffers x (x tile + out tile).
    per_row_bytes = 4 * C * L * itemsize
    if block_b is None:
        tb_cap = max(1, vmem_budget_bytes // per_row_bytes)
        tb = _largest_divisor_at_most(B, tb_cap)
    else:
        assert B % block_b == 0, "block_b must divide the batch size"
        tb = block_b
    grid = (B // tb,)
    # TODO(synk): for very large L where even a TB=1 tile exceeds VMEM, add an
    # L grid axis: pass 1 accumulates the running sum into a VMEM scratch
    # ("arbitrary" axis, init/finalize with pl.when), pass 2 applies the gate.

    weight_bytes = 2 * C * H * 4
    vmem_limit = max(32 * 1024 * 1024,
                     per_row_bytes * tb + 4 * weight_bytes + (1 << 20))

    cost = pl.CostEstimate(
        flops=int(4 * B * C * H + 2 * B * C * L),
        transcendentals=int(B * C),
        bytes_accessed=int(2 * B * C * L * itemsize + weight_bytes),
    )

    kernel = functools.partial(_se_kernel, channels_last=channels_last)
    out = pl.pallas_call(
        kernel,
        out_shape=jax.ShapeDtypeStruct(x_in.shape, x.dtype),
        grid=grid,
        in_specs=[
            pl.BlockSpec((tb,) + blk_tail, lambda i: (i, 0, 0)),
            pl.BlockSpec((C, H), lambda i: (0, 0)),   # weights stay VMEM-resident
            pl.BlockSpec((H, C), lambda i: (0, 0)),
        ],
        out_specs=pl.BlockSpec((tb,) + blk_tail, lambda i: (i, 0, 0)),
        compiler_params=pltpu.CompilerParams(
            dimension_semantics=("parallel",),
            vmem_limit_bytes=int(vmem_limit),
        ),
        cost_estimate=cost,
    )(x_in, w1t, w2t)

    if channels_last:
        out = jnp.transpose(out, (0, 2, 1))    # back to (B, C, L)
    return out


def se_layer_ref(x, w1, w2):
    # Pure-JAX reference mirroring the PyTorch forward exactly.
    y = jnp.mean(x, axis=-1)                 # AdaptiveAvgPool1d(1) -> (B, C)
    h = jnp.maximum(y @ w1.T, 0.0)           # Linear + ReLU
    s = jax.nn.sigmoid(h @ w2.T)             # Linear + Sigmoid
    return x * s[:, :, None]


def _make_inputs(key, B, C, L, reduction):
    H = max(1, C // reduction)
    kx, k1, k2 = jax.random.split(key, 3)
    x = jax.random.normal(kx, (B, C, L), dtype=jnp.float32)
    b1 = 1.0 / (C ** 0.5)
    b2 = 1.0 / (H ** 0.5)
    w1 = jax.random.uniform(k1, (H, C), minval=-b1, maxval=b1, dtype=jnp.float32)
    w2 = jax.random.uniform(k2, (C, H), minval=-b2, maxval=b2, dtype=jnp.float32)
    return x, w1, w2


if __name__ == "__main__":
    key = jax.random.PRNGKey(0)
    k_a, k_b = jax.random.split(key)

    # Case 1: small NCL path; block_b=1 forces a multi-step grid so the batch
    # pipeline + VMEM-resident-weight path is actually exercised.
    x, w1, w2 = _make_inputs(k_a, B=2, C=32, L=16, reduction=16)
    out = jax.block_until_ready(se_layer(x, w1, w2, block_b=1))
    ref = jax.block_until_ready(se_layer_ref(x, w1, w2))
    assert out.shape == x.shape
    assert jnp.allclose(out, ref, atol=1e-4, rtol=1e-4), "NCL path mismatch"

    # Case 2: C = 128 exercises the lane-dense channels-last path.
    x2, w12, w22 = _make_inputs(k_b, B=3, C=128, L=16, reduction=16)
    out2 = jax.block_until_ready(se_layer(x2, w12, w22))
    ref2 = jax.block_until_ready(se_layer_ref(x2, w12, w22))
    assert out2.shape == x2.shape
    assert jnp.allclose(out2, ref2, atol=1e-4, rtol=1e-4), "channels-last mismatch"

    print("KERNEL_OK")
</pallas_src>

<mosaic_0001>
module attributes {stable_mosaic.version = 11 : i64} {
  func.func @_se_kernel(%arg0: i32, %arg1: memref<1x32x16xf32, #tpu.memory_space<vmem>>, %arg2: memref<32x2xf32, #tpu.memory_space<vmem>>, %arg3: memref<2x32xf32, #tpu.memory_space<vmem>>, %arg4: memref<1x32x16xf32, #tpu.memory_space<vmem>>) attributes {dimension_semantics = [#tpu.dimension_semantics<parallel>], iteration_bounds = array<i64: 2>, scalar_prefetch = 0 : i64, scratch_operands = 0 : i64, tpu.core_type = #tpu.core_type<tc>, window_params = [{transform_indices = @transform_0, window_bounds = array<i64: 1, 32, 16>}, {pipeline_mode = #tpu.pipeline_mode<synchronous>, transform_indices = @transform_1, window_bounds = array<i64: 32, 2>}, {pipeline_mode = #tpu.pipeline_mode<synchronous>, transform_indices = @transform_2, window_bounds = array<i64: 2, 32>}, {transform_indices = @transform_3, window_bounds = array<i64: 1, 32, 16>}]} {
    %c0 = arith.constant 0 : index
    %c0_0 = arith.constant 0 : index
    %c0_1 = arith.constant 0 : index
    %0 = vector.load %arg1[%c0, %c0_0, %c0_1] : memref<1x32x16xf32, #tpu.memory_space<vmem>>, vector<1x32x16xf32>
    %cst = arith.constant dense<0.000000e+00> : vector<1x32xf32>
    %1 = vector.multi_reduction <add>, %0, %cst [2] : vector<1x32x16xf32> to vector<1x32xf32>
    %cst_2 = arith.constant 1.600000e+01 : f32
    %2 = vector.broadcast %cst_2 : f32 to vector<1x32xf32>
    %3 = arith.divf %1, %2 : vector<1x32xf32>
    %c0_3 = arith.constant 0 : index
    %c0_4 = arith.constant 0 : index
    %4 = vector.load %arg2[%c0_3, %c0_4] : memref<32x2xf32, #tpu.memory_space<vmem>>, vector<32x2xf32>
    %cst_5 = arith.constant dense<0.000000e+00> : vector<1x2xf32>
    %5 = tpu.matmul %3, %4, %cst_5 {dimension_numbers = #tpu.dot_dimension_numbers<[1], [0], [0], [1], [0, 0, 1, 1], [], []>} : vector<1x32xf32>, vector<32x2xf32>, vector<1x2xf32> -> vector<1x2xf32>
    %cst_6 = arith.constant 0.000000e+00 : f32
    %6 = vector.broadcast %cst_6 : f32 to vector<1x2xf32>
    %7 = arith.maximumf %5, %6 : vector<1x2xf32>
    %c0_7 = arith.constant 0 : index
    %c0_8 = arith.constant 0 : index
    %8 = vector.load %arg3[%c0_7, %c0_8] : memref<2x32xf32, #tpu.memory_space<vmem>>, vector<2x32xf32>
    %cst_9 = arith.constant dense<0.000000e+00> : vector<1x32xf32>
    %9 = tpu.matmul %7, %8, %cst_9 {dimension_numbers = #tpu.dot_dimension_numbers<[1], [0], [0], [1], [0, 0, 1, 1], [], []>} : vector<1x2xf32>, vector<2x32xf32>, vector<1x32xf32> -> vector<1x32xf32>
    %cst_10 = arith.constant 0.000000e+00 : f32
    %10 = vector.broadcast %cst_10 : f32 to vector<1x32xf32>
    %11 = arith.subf %10, %9 : vector<1x32xf32>
    %12 = math.exp %11 : vector<1x32xf32>
    %cst_11 = arith.constant 1.000000e+00 : f32
    %13 = vector.broadcast %cst_11 : f32 to vector<1x32xf32>
    %14 = arith.addf %13, %12 : vector<1x32xf32>
    %15 = tpu.reciprocal %14 {approx = true} : vector<1x32xf32> -> vector<1x32xf32>
    %16 = arith.mulf %14, %15 : vector<1x32xf32>
    %cst_12 = arith.constant 2.000000e+00 : f32
    %17 = vector.broadcast %cst_12 : f32 to vector<1x32xf32>
    %18 = arith.subf %17, %16 : vector<1x32xf32>
    %19 = arith.mulf %15, %18 : vector<1x32xf32>
    %c0_13 = arith.constant 0 : index
    %c0_14 = arith.constant 0 : index
    %c0_15 = arith.constant 0 : index
    %20 = vector.load %arg1[%c0_13, %c0_14, %c0_15] : memref<1x32x16xf32, #tpu.memory_space<vmem>>, vector<1x32x16xf32>
    %21 = vector.shape_cast %19 : vector<1x32xf32> to vector<1x32x1xf32>
    %22 = vector.broadcast %21 : vector<1x32x1xf32> to vector<1x32x16xf32>
    %23 = arith.mulf %20, %22 : vector<1x32x16xf32>
    %c0_16 = arith.constant 0 : index
    %c0_17 = arith.constant 0 : index
    %c0_18 = arith.constant 0 : index
    %24 = vector.load %arg4[%c0_16, %c0_17, %c0_18] : memref<1x32x16xf32, #tpu.memory_space<vmem>>, vector<1x32x16xf32>
    tpu.vector_store %arg4[%c0_16, %c0_17, %c0_18], %23 {strides = array<i32>} : memref<1x32x16xf32, #tpu.memory_space<vmem>>, vector<1x32x16xf32>,
    return
  }
  func.func @transform_0(%arg0: i32) -> (i32, i32, i32) {
    %c0_i32 = arith.constant 0 : i32
    %c0_i32_0 = arith.constant 0 : i32
    %c0_i32_1 = arith.constant 0 : i32
    return %arg0, %c0_i32, %c0_i32_0 : i32, i32, i32
  }
  func.func @transform_1(%arg0: i32) -> (i32, i32) {
    %c0_i32 = arith.constant 0 : i32
    %c0_i32_0 = arith.constant 0 : i32
    %c0_i32_1 = arith.constant 0 : i32
    return %c0_i32, %c0_i32_0 : i32, i32
  }
  func.func @transform_2(%arg0: i32) -> (i32, i32) {
    %c0_i32 = arith.constant 0 : i32
    %c0_i32_0 = arith.constant 0 : i32
    %c0_i32_1 = arith.constant 0 : i32
    return %c0_i32, %c0_i32_0 : i32, i32
  }
  func.func @transform_3(%arg0: i32) -> (i32, i32, i32) {
    %c0_i32 = arith.constant 0 : i32
    %c0_i32_0 = arith.constant 0 : i32
    %c0_i32_1 = arith.constant 0 : i32
    return %arg0, %c0_i32, %c0_i32_0 : i32, i32, i32
  }
}

</mosaic_0001>

<bundles_post_ra>
// kernel: tpu_custom_call.1
= control target key start
LH: loop header
LB: loop body
LE: loop exit
PB: predicated region body
PF: predicated region fallthrough
CT: control target
= control target key end

     0   :  { %s554_s12 = smov 0   ;;  %s617_s0 = inlined_call_operand.vmem [shape: f32[2,32,16], index: 0, kind: input, shape index: {}]   ;;  %s618_s1 = inlined_call_operand.vmem [shape: f32[32,2], index: 1, kind: input, shape index: {}]   ;;  %s619_s2 = inlined_call_operand.vmem [shape: f32[2,32], index: 2, kind: input, shape index: {}]   ;;  %s620_s3 = inlined_call_operand.vmem [shape: f32[2,32,16], index: 3, kind: output, shape index: {}]  }
   0x1 LB: > { %s471_s13 = sadd.s32 4294967295, %s530_s12   ;;  %p475_p0 = scmp.ge.s32.totalorder %s530_s12, 1  ;;  %s530_s12 = sphi %s554_s12, %s13_s12  }
   0x2   : > { %p137_p1 = scmp.lt.s32.totalorder %s530_s12, 3 }
   0x4   : > { %p138_p2 = pnand %p475_p0, %p137_p1 }
   0x5   : > { %p161_p3 = scmp.lt.s32.totalorder (!%p138_p2), %s471_s13, 1 }
   0x6   : > { %141 = sbr.rel (%p138_p2) target bundleno = 721 (0x2d1), region = 32 }
   0xb   : > { %s622_s13 = smov (!%p161_p3, %s471_s13), 1  ;;  %vm175_vm0 = vcmask 130048   ;;  %v532_v8 = vmov 0.0   ;;  %v196_v9 = vld [vmem:[%s618_s1 + $0x18] sm:$0xff]  ;;  %v195_v10 = vld [vmem:[%s618_s1 + $0x10] sm:$0xff]  ;;  %v194_v11 = vld [vmem:[%s618_s1 + $0x8] sm:$0xff]  ;;  %v201_v13 = vlaneseq }
   0xc   : > { %s485_s14 = sshll.u32 %s622_s13, 5  ;;  %494 = vmatprep.subr.mxu0 %v532_v8  ;;  %505 = vmatprep.subr.mxu1 %v532_v8  ;;  %v193_v12 = vld [vmem:[%s618_s1] sm:$0xff]  ;;  %vm533_vm1 = vmmov 0   ;;  %vm212_vm2 = vcmask 130112   ;;  %vm219_vm3 = vcmask 195712   ;;  %vm226_vm4 = vcmask 261312  }
   0xd   : > { %s165_s17 = scalar_lea.vmem %s617_s0, %s485_s14  ;;  %495 = vmatpush3.msra.mxu0 %v196_v9  ;;  %502 = vmatprep.mubr.msk.f32.mxu0 %vm533_vm1, %v532_v8  ;;  %v202_v14 = vand.u32 127, %v201_v13  ;;  %v204_v15 = vshrl.u32 %v201_v13, 7  ;;  %vm228_vm5 = vcmask 261120   ;;  %v302_v38 = vld [vmem:[%s619_s2] sm:$0x3]  ;;  %vm307_vm6 = vcmask 1041408   ;;  %s170_s30 = scalar_lea.vmem %s620_s3, %s485_s14 }
   0xe   : > { %v570_v0 = vld [vmem:[%s165_s17] sm:$0xff]  ;;  %v572_v1 = vld [vmem:[%s165_s17 + $0x10] sm:$0xff]  ;;  %v574_v2 = vld [vmem:[%s165_s17 + $0x8] sm:$0xff]  ;;  %496 = vmatprep.subr.mxu0 %v532_v8  ;;  %507 = vmatprep.mubr.msk.f32.mxu1 %vm533_vm1, %v532_v8  ;;  %vm303_vm7 = vcmask 15360  }
   0xf   : > { %v176_v3 = vsel %vm175_vm0, %v570_v0, 0.0  ;;  %v182_v4 = vsel %vm175_vm0, %v572_v1, 0.0  ;;  %v580_v5 = vld [vmem:[%s165_s17 + $0x18] sm:$0xff]  ;;  %v179_v6 = vsel %vm175_vm0, %v574_v2, 0.0  ;;  %497 = vmatpush3.msra.mxu0 %v195_v10  ;;  %v207_v16 = vadd.s32 4294967288, %v202_v14  ;;  %506 = vmatpush3.msk.msra.mxu1 %vm307_vm6, %v302_v38 }
  0x10   : > { %177 = vadd.xlane.f32.xlu0 %v176_v3  ;;  %183 = vadd.xlane.f32.xlu1 %v182_v4  ;;  %v185_v7 = vsel %vm175_vm0, %v580_v5, 0.0  ;;  %v221_v17 = vadd.s32 4294967272, %v202_v14  ;;  %v214_v19 = vadd.s32 4294967280, %v202_v14  ;;  %v205_v21 = vsub.s32 %v202_v14, %v204_v15 }
  0x11   : > { %498 = vmatprep.subr.mxu0 %v532_v8  ;;  %v210_v23 = vsub.s32 %v207_v16, %v204_v15  ;;  %v391_v51 = vsub.s32 0, %v204_v15 }
  0x12   : > { %499 = vmatpush3.msra.mxu0 %v194_v11  ;;  %v224_v24 = vsub.s32 %v221_v17, %v204_v15  ;;  %v217_v25 = vsub.s32 %v214_v19, %v204_v15 }
  0x13   : > { %500 = vmatprep.subr.mxu0 %v532_v8 }
  0x14   : > { %180 = vadd.xlane.f32.xlu0 %v179_v6  ;;  %186 = vadd.xlane.f32.xlu1 %v185_v7 }
  0x15   : > { %501 = vmatpush3.msra.mxu0 %v193_v12 }
  0x99   : > { %v178_v18 = vpop.xlane.xlu0 %177  ;;  %v184_v20 = vpop.xlane.xlu1 %183 }
  0x9a   : > { %v189_v22 = vmul.f32 0.0625, %v178_v18  ;;  %v191_v26 = vmul.f32 0.0625, %v184_v20 }
  0x9c   : > { %v206_v31 = vrot.slane %v189_v22, %v205_v21  ;;  %v218_v34 = vrot.slane %v191_v26, %v217_v25 }
  0x9d   : > { %v181_v27 = vpop.xlane.xlu0 %180  ;;  %v187_v28 = vpop.xlane.xlu1 %186 }
  0x9e   : > { %v190_v29 = vmul.f32 0.0625, %v181_v27  ;;  %v192_v30 = vmul.f32 0.0625, %v187_v28 }
  0xa0   : > { %v211_v32 = vrot.slane %v190_v29, %v210_v23  ;;  %v225_v33 = vrot.slane %v192_v30, %v224_v24 }
  0xa2   : > { %v213_v35 = vsel %vm212_vm2, %v211_v32, %v206_v31 }
  0xa3   : > { %v220_v36 = vsel %vm219_vm3, %v218_v34, %v213_v35 }
  0xa4   : > { %v227_v37 = vsel %vm226_vm4, %v225_v33, %v220_v36 }
  0xa5   : > { %503 = vmatmul.mubr.msk.f32.vlgmr.msra.gmra.mxu0 %vm228_vm5, %v227_v37 }
 0x165   : > { %v297_v39 = vpop.f32.mrf.mxu0 }
 0x166   : > { %v301_v40 = vmax.f32 %v297_v39, 0.0 }
 0x167   : > { %v504_v41 = vpop.f32.mrf.mxu0 }
 0x168   : > { %508 = vmatmul.mubr.msk.f32.vlgmr.msra.gmra.mxu1 %vm303_vm7, %v301_v40 }
 0x228   : > { %v377_v42 = vpop.f32.mrf.mxu1 }
 0x229   : > { %v381_v43 = vsub.f32 0.0, %v377_v42 }
 0x22a   : > { %v509_v44 = vpop.f32.mrf.mxu1 }
 0x22b   : > { %v382_v45 = vmul.f32 1.442695, %v381_v43 }
 0x22d   : > { %520 = vpow2.f32 %v382_v45 }
 0x23a   : > { %v521_v46 = vpop.eup %520 }
 0x23b   : > { %v384_v47 = vadd.f32 1.0, %v521_v46 }
 0x23d   : > { %522 = vrcp.f32 %v384_v47 }
 0x24a   : > { %v523_v48 = vpop.eup %522 }
 0x24b   : > { %v386_v49 = vmul.f32 %v523_v48, %v384_v47 }
 0x24d   : > { %v387_v50 = vsub.f32 2.0, %v386_v49 }
 0x24f   : > { %v388_v52 = vmul.f32 %v523_v48, %v387_v50 }
 0x251   : > { %v392_v53 = vrot.slane %v388_v52, %v391_v51 }
 0x253   : > { %398 = vbcast.lane.b32.xlu1 %v392_v53, 264  ;;  %394 = vbcast.lane.b32.xlu0 %v392_v53, 256 }
 0x257   : > { %402 = vbcast.lane.b32.xlu1 %v392_v53, 272 }
 0x25b   : > { %406 = vbcast.lane.b32.xlu1 %v392_v53, 280 }
 0x2c5   : > { %v399_v54 = vpop.permute.xlu1 %398  ;;  %v395_v55 = vpop.permute.xlu0 %394 }
 0x2c6   : > { %v409_v56 = vmul.f32 %v399_v54, %v574_v2  ;;  %v408_v57 = vmul.f32 %v395_v55, %v570_v0 }
 0x2c8   : > { %413 = vst.msk [vmem:[%s170_s30 + $0x8] sm:$0xff] %vm175_vm0, %v409_v56  ;;  %412 = vst.msk [vmem:[%s170_s30] sm:$0xff] %vm175_vm0, %v408_v57 }
 0x2c9   : > { %v403_v58 = vpop.permute.xlu1 %402 }
 0x2ca   : > { %v410_v59 = vmul.f32 %v403_v58, %v572_v1 }
 0x2cc   : > { %414 = vst.msk [vmem:[%s170_s30 + $0x10] sm:$0xff] %vm175_vm0, %v410_v59 }
 0x2cd   : > { %v407_v60 = vpop.permute.xlu1 %406 }
 0x2ce   : > { %v411_v61 = vmul.f32 %v407_v60, %v580_v5 }
 0x2d0   : > { %415 = vst.msk [vmem:[%s170_s30 + $0x18] sm:$0xff] %vm175_vm0, %v411_v61 }
 0x2d1 PF: > { %s13_s12 = sadd.s32 1, %s530_s12  }
 0x2d2   : > { %p10_p4 = scmp.ge.s32.totalorder %s13_s12, 4  }
 0x2d4   :  { %12 = sbr.rel (!%p10_p4) target bundleno = 1 (0x1), region = 62 }

</bundles_post_ra>
